<compile_context>
chip_gen: v7x
topology: tpu7x:2x2x1
jax: 0.10.0
libtpu: 0.0.40
codegen_flags: <defaults>
</compile_context>

<pallas_src>
import jax
import jax.numpy as jnp
from jax import lax
from jax.experimental import pallas as pl
from jax.experimental.pallas import tpu as pltpu


def conv_bn_relu(x_nchw, weight_oihw, gamma, beta, running_mean, running_var,
                 *, stride=1, pad=1, eps=1e-5):
    N, Cin, H, W = x_nchw.shape
    Cout, _, KH, KW = weight_oihw.shape
    Ho = (H + 2 * pad - KH) // stride + 1
    Wo = (W + 2 * pad - KW) // stride + 1
    Hp = H + 2 * pad
    Wp = W + 2 * pad
    WpC = Wp * Cin
    WoC = Wo * Cout
    f32 = jnp.float32

    # ---- BatchNorm (eval / running-stats) folded to per-channel scale/bias ----
    # TODO(synk): training-mode BatchNorm (batch statistics + running-stat
    # update) is not implemented; inference semantics are used here.
    inv = lax.rsqrt(running_var.astype(f32) + eps)
    scale = gamma.astype(f32) * inv                                # (Cout,)
    bias = beta.astype(f32) - running_mean.astype(f32) * scale     # (Cout,)

    # ---- input: NCHW -> NHWC, one small spatial zero-pad, bf16, flatten (W,Cin) ----
    x = jnp.transpose(x_nchw, (0, 2, 3, 1)).astype(jnp.bfloat16)
    xp = jnp.pad(x, ((0, 0), (pad, pad), (pad, pad), (0, 0)))
    xp = xp.reshape(N, Hp, WpC)                    # lane axis = Wp*Cin

    # ---- lowered weights (BN scale folded): block-Toeplitz per vertical tap ----
    # B[di, wp*Cin + c, w*Cout + o] = weight[o, c, di, wp - stride*w] * scale[o]
    wf = jnp.transpose(weight_oihw.astype(f32) * scale[:, None, None, None],
                       (2, 3, 1, 0))               # (KH, KW, Cin, Cout)
    wp_idx = jnp.arange(Wp)[:, None]
    w_idx = jnp.arange(Wo)[None, :]
    dj = wp_idx - stride * w_idx                   # (Wp, Wo)
    valid = ((dj >= 0) & (dj < KW)).astype(f32)[:, :, None, None]
    dj_c = jnp.clip(dj, 0, KW - 1)
    b_rows = []
    for di in range(KH):
        taps = wf[di][dj_c] * valid                                # (Wp, Wo, Cin, Cout)
        b_rows.append(jnp.transpose(taps, (0, 2, 1, 3)).reshape(WpC, WoC))
    B = jnp.stack(b_rows, axis=0).astype(jnp.bfloat16)             # (KH, WpC, WoC)

    bias_row = jnp.tile(bias, Wo).reshape(1, WoC)                  # (1, WoC) f32
    row_span = stride * (Ho - 1) + 1

    def kernel(x_ref, b_ref, bias_ref, o_ref):
        xv = x_ref[0]                                              # (Hp, WpC) bf16
        acc = jnp.zeros((Ho, WoC), f32)
        for di in range(KH):                                       # unrolled taps
            rows = xv[di:di + row_span:stride, :]                  # (Ho, WpC)
            acc = acc + jnp.dot(rows, b_ref[di],
                                preferred_element_type=f32)        # MXU, f32 acc
        o_ref[0] = jnp.maximum(acc + bias_ref[...], 0.0).astype(o_ref.dtype)

    flops = 2 * N * KH * Ho * WpC * WoC
    bytes_accessed = (xp.size * 2 + B.size * 2 + bias_row.size * 4
                      + N * Ho * WoC * 4)

    out = pl.pallas_call(
        kernel,
        out_shape=jax.ShapeDtypeStruct((N, Ho, WoC), f32),
        grid=(N,),
        in_specs=[
            pl.BlockSpec((1, Hp, WpC), lambda n: (n, 0, 0)),
            pl.BlockSpec((KH, WpC, WoC), lambda n: (0, 0, 0)),
            pl.BlockSpec((1, WoC), lambda n: (0, 0)),
        ],
        out_specs=pl.BlockSpec((1, Ho, WoC), lambda n: (n, 0, 0)),
        compiler_params=pltpu.CompilerParams(
            dimension_semantics=("parallel",)),
        cost_estimate=pl.CostEstimate(flops=flops, transcendentals=0,
                                      bytes_accessed=bytes_accessed),
    )(xp, B, bias_row)

    out = out.reshape(N, Ho, Wo, Cout)
    return jnp.transpose(out, (0, 3, 1, 2))        # back to NCHW


if __name__ == "__main__":
    key = jax.random.PRNGKey(0)
    kx, kw, kg, kb, km, kv = jax.random.split(key, 6)

    # ConvBnReLU(in_channels=4, out_channels=8, kernel_size=3, stride=1, pad=1)
    N, Cin, H, W = 2, 4, 16, 16
    Cout, KH, KW = 8, 3, 3

    x = jax.random.normal(kx, (N, Cin, H, W), jnp.float32)
    weight = jax.random.normal(kw, (Cout, Cin, KH, KW), jnp.float32) * 0.1
    gamma = jax.random.uniform(kg, (Cout,), jnp.float32, minval=0.5, maxval=1.5)
    beta = jax.random.normal(kb, (Cout,), jnp.float32) * 0.1
    rmean = jax.random.normal(km, (Cout,), jnp.float32) * 0.1
    rvar = jax.random.uniform(kv, (Cout,), jnp.float32, minval=0.5, maxval=1.5)

    out = conv_bn_relu(x, weight, gamma, beta, rmean, rvar)
    out = jax.block_until_ready(out)
    assert out.shape == (N, Cout, H, W)

    inv = 1.0 / jnp.sqrt(rvar + 1e-5)
    scale = gamma * inv
    bias = beta - rmean * scale

    # tight check: reference computed with the same bf16-quantized operands
    xq = x.astype(jnp.bfloat16).astype(jnp.float32)
    wq = (weight * scale[:, None, None, None]).astype(jnp.bfloat16).astype(jnp.float32)
    conv_q = lax.conv_general_dilated(
        xq, wq, (1, 1), ((1, 1), (1, 1)),
        dimension_numbers=("NCHW", "OIHW", "NCHW"),
        precision=lax.Precision.HIGHEST)
    ref_tight = jnp.maximum(conv_q + bias[None, :, None, None], 0.0)
    assert jnp.allclose(out, ref_tight, atol=1e-4, rtol=1e-4), \
        float(jnp.max(jnp.abs(out - ref_tight)))

    # loose sanity check against exact f32 module semantics (bf16 operand error)
    conv_f = lax.conv_general_dilated(
        x, weight, (1, 1), ((1, 1), (1, 1)),
        dimension_numbers=("NCHW", "OIHW", "NCHW"),
        precision=lax.Precision.HIGHEST)
    ref_f32 = jnp.maximum(conv_f * scale[None, :, None, None]
                          + bias[None, :, None, None], 0.0)
    assert jnp.allclose(out, ref_f32, atol=1e-1, rtol=1e-1), \
        float(jnp.max(jnp.abs(out - ref_f32)))

    print("KERNEL_OK")
</pallas_src>

<mosaic_0001>
module attributes {stable_mosaic.version = 11 : i64} {
  func.func @kernel(%arg0: i32, %arg1: memref<1x18x72xbf16, #tpu.memory_space<vmem>>, %arg2: memref<3x72x128xbf16, #tpu.memory_space<vmem>>, %arg3: memref<1x128xf32, #tpu.memory_space<vmem>>, %arg4: memref<1x16x128xf32, #tpu.memory_space<vmem>>) attributes {dimension_semantics = [#tpu.dimension_semantics<parallel>], iteration_bounds = array<i64: 2>, scalar_prefetch = 0 : i64, scratch_operands = 0 : i64, tpu.core_type = #tpu.core_type<tc>, window_params = [{transform_indices = @transform_0, window_bounds = array<i64: 1, 18, 72>}, {pipeline_mode = #tpu.pipeline_mode<synchronous>, transform_indices = @transform_1, window_bounds = array<i64: 3, 72, 128>}, {pipeline_mode = #tpu.pipeline_mode<synchronous>, transform_indices = @transform_2, window_bounds = array<i64: 1, 128>}, {transform_indices = @transform_3, window_bounds = array<i64: 1, 16, 128>}]} {
    %c0 = arith.constant 0 : index
    %c0_0 = arith.constant 0 : index
    %c0_1 = arith.constant 0 : index
    %0 = vector.load %arg1[%c0, %c0_0, %c0_1] : memref<1x18x72xbf16, #tpu.memory_space<vmem>>, vector<1x18x72xbf16>
    %1 = vector.shape_cast %0 : vector<1x18x72xbf16> to vector<18x72xbf16>
    %cst = arith.constant 0.000000e+00 : f32
    %2 = vector.broadcast %cst : f32 to vector<16x128xf32>
    %3 = vector.extract_strided_slice %1 {offsets = [0, 0], sizes = [16, 72], strides = [1, 1]} : vector<18x72xbf16> to vector<16x72xbf16>
    %c0_2 = arith.constant 0 : index
    %c0_3 = arith.constant 0 : index
    %c0_4 = arith.constant 0 : index
    %4 = vector.load %arg2[%c0_2, %c0_3, %c0_4] : memref<3x72x128xbf16, #tpu.memory_space<vmem>>, vector<1x72x128xbf16>
    %5 = vector.shape_cast %4 : vector<1x72x128xbf16> to vector<72x128xbf16>
    %cst_5 = arith.constant dense<0.000000e+00> : vector<16x128xf32>
    %6 = tpu.matmul %3, %5, %cst_5 {dimension_numbers = #tpu.dot_dimension_numbers<[1], [0], [0], [1], [0, 0, 1, 1], [], []>} : vector<16x72xbf16>, vector<72x128xbf16>, vector<16x128xf32> -> vector<16x128xf32>
    %7 = arith.addf %2, %6 : vector<16x128xf32>
    %8 = vector.extract_strided_slice %1 {offsets = [1, 0], sizes = [16, 72], strides = [1, 1]} : vector<18x72xbf16> to vector<16x72xbf16>
    %c1 = arith.constant 1 : index
    %c0_6 = arith.constant 0 : index
    %c0_7 = arith.constant 0 : index
    %9 = vector.load %arg2[%c1, %c0_6, %c0_7] : memref<3x72x128xbf16, #tpu.memory_space<vmem>>, vector<1x72x128xbf16>
    %10 = vector.shape_cast %9 : vector<1x72x128xbf16> to vector<72x128xbf16>
    %cst_8 = arith.constant dense<0.000000e+00> : vector<16x128xf32>
    %11 = tpu.matmul %8, %10, %cst_8 {dimension_numbers = #tpu.dot_dimension_numbers<[1], [0], [0], [1], [0, 0, 1, 1], [], []>} : vector<16x72xbf16>, vector<72x128xbf16>, vector<16x128xf32> -> vector<16x128xf32>
    %12 = arith.addf %7, %11 : vector<16x128xf32>
    %13 = vector.extract_strided_slice %1 {offsets = [2, 0], sizes = [16, 72], strides = [1, 1]} : vector<18x72xbf16> to vector<16x72xbf16>
    %c2 = arith.constant 2 : index
    %c0_9 = arith.constant 0 : index
    %c0_10 = arith.constant 0 : index
    %14 = vector.load %arg2[%c2, %c0_9, %c0_10] : memref<3x72x128xbf16, #tpu.memory_space<vmem>>, vector<1x72x128xbf16>
    %15 = vector.shape_cast %14 : vector<1x72x128xbf16> to vector<72x128xbf16>
    %cst_11 = arith.constant dense<0.000000e+00> : vector<16x128xf32>
    %16 = tpu.matmul %13, %15, %cst_11 {dimension_numbers = #tpu.dot_dimension_numbers<[1], [0], [0], [1], [0, 0, 1, 1], [], []>} : vector<16x72xbf16>, vector<72x128xbf16>, vector<16x128xf32> -> vector<16x128xf32>
    %17 = arith.addf %12, %16 : vector<16x128xf32>
    %c0_12 = arith.constant 0 : index
    %c0_13 = arith.constant 0 : index
    %18 = vector.load %arg3[%c0_12, %c0_13] : memref<1x128xf32, #tpu.memory_space<vmem>>, vector<1x128xf32>
    %19 = vector.broadcast %18 : vector<1x128xf32> to vector<16x128xf32>
    %20 = arith.addf %17, %19 : vector<16x128xf32>
    %cst_14 = arith.constant 0.000000e+00 : f32
    %21 = vector.broadcast %cst_14 : f32 to vector<16x128xf32>
    %22 = arith.maximumf %20, %21 : vector<16x128xf32>
    %c0_15 = arith.constant 0 : index
    %c0_16 = arith.constant 0 : index
    %c0_17 = arith.constant 0 : index
    %23 = vector.load %arg4[%c0_15, %c0_16, %c0_17] : memref<1x16x128xf32, #tpu.memory_space<vmem>>, vector<1x16x128xf32>
    %24 = vector.shape_cast %23 : vector<1x16x128xf32> to vector<16x128xf32>
    %25 = vector.shape_cast %22 : vector<16x128xf32> to vector<1x16x128xf32>
    tpu.vector_store %arg4[%c0_15, %c0_16, %c0_17], %25 {strides = array<i32>} : memref<1x16x128xf32, #tpu.memory_space<vmem>>, vector<1x16x128xf32>,
    return
  }
  func.func @transform_0(%arg0: i32) -> (i32, i32, i32) {
    %c0_i32 = arith.constant 0 : i32
    %c0_i32_0 = arith.constant 0 : i32
    %c0_i32_1 = arith.constant 0 : i32
    return %arg0, %c0_i32, %c0_i32_0 : i32, i32, i32
  }
  func.func @transform_1(%arg0: i32) -> (i32, i32, i32) {
    %c0_i32 = arith.constant 0 : i32
    %c0_i32_0 = arith.constant 0 : i32
    %c0_i32_1 = arith.constant 0 : i32
    %c0_i32_2 = arith.constant 0 : i32
    return %c0_i32, %c0_i32_0, %c0_i32_1 : i32, i32, i32
  }
  func.func @transform_2(%arg0: i32) -> (i32, i32) {
    %c0_i32 = arith.constant 0 : i32
    %c0_i32_0 = arith.constant 0 : i32
    %c0_i32_1 = arith.constant 0 : i32
    return %c0_i32, %c0_i32_0 : i32, i32
  }
  func.func @transform_3(%arg0: i32) -> (i32, i32, i32) {
    %c0_i32 = arith.constant 0 : i32
    %c0_i32_0 = arith.constant 0 : i32
    %c0_i32_1 = arith.constant 0 : i32
    return %arg0, %c0_i32, %c0_i32_0 : i32, i32, i32
  }
}

</mosaic_0001>

<bundles_post_ra>
// kernel: tpu_custom_call.1
= control target key start
LH: loop header
LB: loop body
LE: loop exit
PB: predicated region body
PF: predicated region fallthrough
CT: control target
= control target key end

     0   :  { %8 = vsyncpa [#allocation3], 0  ;;  %s1030_s0 = inlined_call_operand.vmem [shape: bf16[2,18,72], index: 0, kind: input, shape index: {}]   ;;  %s1031_s1 = inlined_call_operand.hbm [shape: bf16[3,72,128], index: 1, kind: input, shape index: {}]   ;;  %s1032_s2 = inlined_call_operand.vmem [shape: f32[1,128], index: 2, kind: input, shape index: {}]   ;;  %s1033_s3 = inlined_call_operand.hbm [shape: f32[2,16,128], index: 3, kind: output, shape index: {}]  }
   0x1   :  { %9 = vsyncpa [#allocation4], 0 }
   0x2   :  { %11 = vsyncpa [#allocation4 + $0x1], 0  ;;  %s861_s12 = smov 0   ;;  %s863_s13 = smov 0  }
   0x3   :  { %s865_s14 = smov 0   ;;  %s867_s15 = smov 0  }
   0x4 LB: > { %s882_s16 = sadd.s32 4294967295, %s831_s15   ;;  %s568_s17 = sadd.s32 4294967294, %s831_s15   ;;  %s831_s15 = sphi %s867_s15, %s1049_s15   ;;  %s827_s14 = sphi %s865_s14, %s1048_s14   ;;  %s823_s13 = sphi %s863_s13, %s1047_s13   ;;  %s819_s12 = sphi %s861_s12, %s1046_s12  }
   0x5   : > { %s886_s18 = sadd.s32 1, %s831_s15   ;;  %s92_s19 = sadd.s32 1, %s827_s14 }
   0x6   : > { %s89_s20 = ssub.s32 %s831_s15, %s886_s18  ;;  %p102_p0 = scmp.ne.s32.totalorder %s827_s14, %s823_s13 }
   0x7   : > { %p90_p1 = scmp.eq.s32.totalorder %s89_s20, 0  ;;  %p103_p2 = scmp.eq.s32.totalorder %s882_s16, 1 }
   0x8   : > { %p108_p3 = scmp.ne.s32.totalorder %s823_s13, %s819_s12  ;;  %p109_p4 = scmp.eq.s32.totalorder %s568_s17, 1 }
   0x9   : > { %s897_s21 = scalar_select %p90_p1, %s827_s14, %s92_s19  }
   0xa   : > { %p899_p5 = por %p103_p2, %p102_p0  ;;  %p903_p6 = por %p109_p4, %p108_p3 }
   0xb   : > { %p569_p7 = scmp.ge.s32.totalorder %s831_s15, 1  ;;  %p116_p8 = scmp.lt.s32.totalorder %s831_s15, 3 }
   0xc   : > { %s1037_s22 = scalar_select %p899_p5, 1, 0 }
   0xd   : > { %s1038_s23 = scalar_select %p903_p6, 1, 0 }
   0xe   : > { %p1034_p9 = scmp.eq.s32.totalorder %s882_s16, 0  ;;  %p910_p10 = pnand %p569_p7, %p116_p8 }
   0xf   : > { %s833_s25 = smov [#allocation2]   ;;  %s737_s30 = scalar_lea.hbm %s1031_s1, 1728 }
  0x10   : > { %s1039_s24 = scalar_select %p910_p10, 1, 0 }
  0x11   : > { %s128_s26 = sshll.u32 %s833_s25, 4  ;;  %p670_p11 = pneg %p910_p10  ;;  %s129_s26 = int_to_ptr.vmem [resolvable:$true] %s128_s26 }
  0x12   : > { %p738_p13 = scmp.ne.s32.totalorder %s1031_s1, %s737_s30  ;;  %p744_p3 = scmp.lt.u32.totalorder %s737_s30, %s1031_s1 }
  0x13   : > { %p918_p12 = pnand %p1034_p9, %p670_p11 }
  0x15   : > { %p739_p0 = pneg %p918_p12 }
  0x17   : > { %p740_p1 = pnand %p739_p0, %p738_p13 }
  0x19   : > { %p741_p2 = pneg %p740_p1 }
  0x1b   : > { %p746_p4 = pnand %p744_p3, %p741_p2 }
  0x1d   : > { %749 = shalt.err (!%p746_p4)
}
  0x1e   : > { %s750_s8 = scalar_lea.vmem %s129_s26, 1728  ;;  %p758_p9 = scmp.lt.s32.totalorder %s129_s26, %s129_s26 }
  0x1f   : > { %p751_p7 = scmp.ne.s32.totalorder %s129_s26, %s750_s8  ;;  %p759_p6 = scmp.lt.s32.totalorder %s750_s8, %s750_s8 }
  0x21   : > { %p753_p8 = pnand %p751_p7, %p739_p0  ;;  %p760_p5 = por %p759_p6, %p758_p9 }
  0x23   : > { %p754_p11 = pneg %p753_p8 }
  0x25   : > { %p761_p10 = pnand %p760_p5, %p754_p11 }
  0x27   : > { %764 = shalt.err (!%p761_p10)
}
  0x28   : > { %s834_s9 = smov 64   ;;  %s835_s10 = smov 4  }
  0x29   : > { %673 = dma.hbm_to_vmem [thread:$0]  (!%p918_p12), %s1031_s1, 1728, %s129_s26, [#allocation3], %s834_s9, %s834_s9, %s835_s10  }
  0x2a   : > { %p1041_p13 = scmp.ne.s32.totalorder %s1039_s24, 0 }
  0x2b   : > { %p1042_p1 = scmp.eq.s32.totalorder (!%p1041_p13), %s882_s16, 0 }
  0x2c   : > { %155 = sbr.rel (%p1041_p13) target bundleno = 329 (0x149), region = 32 }
  0x33   : > { %810 = dma.done.wait (%p1042_p1), [#allocation3], 1728   ;;  %p1043_p0 = pmov %p1042_p1 }
  0x34   : > { %v836_v0 = vmov 0.0   ;;  %vm837_vm0 = vmmov 0   ;;  %p179_p5 = scmp.lt.s32.totalorder %s882_s16, 1  ;;  %v720_v1 = vld [vmem:[#allocation2 + $0x24] sm:$0xff]   ;;  %v722_v3 = vld [vmem:[#allocation2 + $0x2c] sm:$0xff]   ;;  %v724_v5 = vld [vmem:[#allocation2 + $0x34] sm:$0xff]  }
  0x35   : > { %812 = vsyncadd (%p1043_p0), [#allocation3], 4294965568  ;;  %621 = vmatprep.subr.bf16.mxu0 %v836_v0  ;;  %635 = vmatprep.subr.bf16.mxu1 %v836_v0  ;;  %v721_v2 = vld [vmem:[#allocation2] sm:$0xff]   ;;  %v723_v4 = vld [vmem:[#allocation2 + $0x8] sm:$0xff]   ;;  %vm215_vm1 = vsmask.f32 7424 }
  0x36   : > { %631 = vmatprep.mubr.msk.bf16.mxu0 %vm837_vm0, %v836_v0  ;;  %645 = vmatprep.mubr.msk.bf16.mxu1 %vm837_vm0, %v836_v0  ;;  %s180_s19 = scalar_select %p179_p5, %s882_s16, 1  ;;  %v725_v6 = vld [vmem:[#allocation2 + $0x10] sm:$0xff]   ;;  %v726_v7 = vld [vmem:[#allocation2 + $0x3c] sm:$0xff]   ;;  %v728_v8 = vld [vmem:[#allocation2 + $0x44] ss:$0 sps:$4 sm:$0xff]   ;;  %vm259_vm2 = vcmask 1043456  }
  0x37   : > { %622 = vmatpush3.bf16.msra.mxu0 %v720_v1  ;;  %636 = vmatpush3.bf16.msra.mxu1 %v721_v2  ;;  %v727_v10 = vld [vmem:[#allocation2 + $0x18] sm:$0xff]   ;;  %v729_v12 = vld [vmem:[#allocation2 + $0x20] ss:$0 sps:$4 sm:$0xff]   ;;  %v261_v17 = vsel %vm259_vm2, %v728_v8, 0  ;;  %vm255_vm3 = vcmask 588800   ;;  %v732_v22 = vld [vmem:[#allocation2 + $0x48] sm:$0xff]  }
  0x38   : > { %623 = vmatprep.subr.bf16.mxu0 %v836_v0  ;;  %s663_s20 = smul.u32 12, %s180_s19  ;;  %637 = vmatprep.subr.bf16.mxu1 %v836_v0  ;;  %v334_v19 = vsel %vm259_vm2, %v729_v12, 0  ;;  %v733_v23 = vld [vmem:[#allocation2 + $0x50] sm:$0xff]   ;;  %v734_v24 = vld [vmem:[#allocation2 + $0x58] sm:$0xff]   ;;  %v735_v25 = vld [vmem:[#allocation2 + $0x60] sm:$0xff]   ;;  %vm387_vm4 = vcmask 1046528  }
  0x39   : > { %v736_v26 = vld [vmem:[#allocation2 + $0x68] ss:$0 sps:$4 sm:$0xff]   ;;  %s176_s27 = sand.u32 1, %s823_s13   ;;  %s602_s6 = sshll.u32 %s882_s16, 8 }
  0x3a   : > { %s183_s26 = scalar_lea.vmem %s1030_s0, %s663_s20  ;;  %v422_v29 = vsel %vm259_vm2, %v736_v26, 0  ;;  %s574_s28 = sshll.u32 %s176_s27, 4  ;;  %v596_v42 = vld [vmem:[%s1032_s2] ss:$0 sm:$0xff] }
  0x3b   : > { %624 = vmatpush3.bf16.msra.mxu0 %v722_v3  ;;  %638 = vmatpush3.bf16.msra.mxu1 %v723_v4  ;;  %v730_v9 = vld [vmem:[%s183_s26] sm:$0xff]   ;;  %v731_v11 = vld [vmem:[%s183_s26 + $0x8] ss:$0 sps:$4 sm:$0x11]   ;;  %s178_s4 = scalar_lea.vmem [#allocation5], %s574_s28  ;;  %s987_s9 = scalar_lea.hbm %s1033_s3, %s602_s6 }
  0x3c   : > { %625 = vmatprep.subr.bf16.mxu0 %v836_v0  ;;  %639 = vmatprep.subr.bf16.mxu1 %v836_v0  ;;  %v217_v13 = vshrl.u32 %v730_v9, 16  ;;  %v219_v14 = vshll.u32 %v730_v9, 16  ;;  %v224_v15 = vshll.u32 %v731_v11, 16  ;;  %v388_v27 = vrot.slane %v730_v9, 1  ;;  %s494_s5 = sshll.u32 %s178_s4, 4  ;;  %s989_s10 = scalar_lea.sflag [#allocation4], %s176_s27  ;;  %s982_s5 = int_to_ptr.vmem [resolvable:$true] %s494_s5 }
  0x3d   : > { %v389_v28 = vrot.slane %v731_v11, 1  ;;  %s765_s11 = scalar_lea.vmem %s982_s5, 256  ;;  %p1044_p9 = scmp.ne.s32.totalorder %s1037_s22, 0 }
  0x3e   : > { %v221_v16 = vrot.slane %v219_v14, 1  ;;  %v226_v18 = vrot.slane %v224_v15, 1  ;;  %p766_p6 = scmp.ne.s32.totalorder %s982_s5, %s765_s11  ;;  %s838_s16 = smov [#allocation5]  }
  0x3f   : > { %626 = vmatpush3.bf16.msra.mxu0 %v724_v5  ;;  %640 = vmatpush3.bf16.msra.mxu1 %v725_v6  ;;  %v390_v30 = vsel %vm387_vm4, %v388_v27, %v389_v28  ;;  %s769_s17 = sshll.u32 %s838_s16, 4  ;;  %s770_s17 = int_to_ptr.vmem [resolvable:$false] %s769_s17 }
  0x40   : > { %627 = vmatprep.subr.bf16.mxu0 %v836_v0  ;;  %641 = vmatprep.subr.bf16.mxu1 %v836_v0  ;;  %v222_v20 = vor.u32 %v221_v16, %v217_v13  ;;  %p767_p10 = pnand %p766_p6, %p1044_p9  ;;  %s771_s19 = scalar_lea.vmem %s770_s17, 512 }
  0x41   : > { %p772_p2 = scmp.lt.s32.totalorder %s982_s5, %s770_s17  ;;  %p773_p3 = scmp.lt.s32.totalorder %s771_s19, %s765_s11 }
  0x42   : > { %v227_v21 = vsel %vm215_vm1, %v222_v20, %v226_v18  ;;  %p768_p12 = pneg %p767_p10 }
  0x43   : > { %628 = vmatpush3.bf16.msra.mxu0 %v726_v7  ;;  %642 = vmatpush3.bf16.msra.mxu1 %v727_v10  ;;  %p774_p4 = por %p773_p3, %p772_p2 }
  0x44   : > { %629 = vmatprep.subr.bf16.mxu0 %v836_v0  ;;  %643 = vmatprep.subr.bf16.mxu1 %v836_v0 }
  0x45   : > { %p775_p7 = pnand %p774_p4, %p768_p12 }
  0x47   : > { %630 = vmatpush3.bf16.msra.mxu0 %v261_v17  ;;  %644 = vmatpush3.bf16.msra.mxu1 %v334_v19 }
  0x48   : > { %649 = vmatprep.subr.bf16.mxu0 %v836_v0 }
  0x4a   : > { %632 = vmatmul.mubr.msk.bf16.vlgmr.msra.gmra.mrb[0].mxu0 %vm255_vm3, %v227_v21  ;;  %646 = vmatmul.mubr.msk.bf16.vlgmr.msra.gmra.mrb[0].mxu1 %vm255_vm3, %v730_v9 }
  0x4b   : > { %650 = vmatpush3.bf16.msra.mxu0 %v732_v22  ;;  %659 = vmatprep.mubr.msk.bf16.mxu0 %vm837_vm0, %v836_v0 }
  0x4c   : > { %651 = vmatprep.subr.bf16.mxu0 %v836_v0 }
  0x4f   : > { %652 = vmatpush3.bf16.msra.mxu0 %v733_v23 }
  0x50   : > { %653 = vmatprep.subr.bf16.mxu0 %v836_v0 }
  0x53   : > { %654 = vmatpush3.bf16.msra.mxu0 %v734_v24 }
  0x54   : > { %655 = vmatprep.subr.bf16.mxu0 %v836_v0 }
  0x57   : > { %656 = vmatpush3.bf16.msra.mxu0 %v735_v25 }
  0x58   : > { %657 = vmatprep.subr.bf16.mxu0 %v836_v0 }
  0x5b   : > { %658 = vmatpush3.bf16.msra.mxu0 %v422_v29 }
  0x5e   : > { %660 = vmatmul.mubr.msk.bf16.vlgmr.msra.gmra.mrb[4].mxu0 %vm255_vm3, %v390_v30 }
 0x11d   : > { %v297_v31 = vpop.f32.mrb[0].mxu0  ;;  %v370_v32 = vpop.f32.mrb[0].mxu1 }
 0x11e   : > { %v633_v33 = vpop.f32.mrb[1].mxu0  ;;  %v371_v34 = vadd.f32 %v370_v32, %v297_v31  ;;  %v647_v35 = vpop.f32.mrb[1].mxu1 }
 0x11f   : > { %v300_v36 = vpop.f32.mrb[2].mxu0  ;;  %v373_v37 = vpop.f32.mrb[2].mxu1 }
 0x120   : > { %v634_v38 = vpop.f32.mrb[3].mxu0  ;;  %v374_v39 = vadd.f32 %v373_v37, %v300_v36  ;;  %v648_v40 = vpop.f32.mrb[3].mxu1 }
 0x131   : > { %v458_v41 = vpop.f32.mrb[4].mxu0 }
 0x132   : > { %v465_v43 = vadd.f32 %v458_v41, %v371_v34  ;;  %v661_v44 = vpop.f32.mrb[5].mxu0 }
 0x133   : > { %v461_v45 = vpop.f32.mrb[6].mxu0 }
 0x134   : > { %v474_v46 = vadd.f32 %v596_v42, %v465_v43  ;;  %v466_v47 = vadd.f32 %v461_v45, %v374_v39  ;;  %v662_v48 = vpop.f32.mrb[7].mxu0 }
 0x136   : > { %v476_v49 = vmax.f32 %v474_v46, 0.0  ;;  %v475_v50 = vadd.f32 %v596_v42, %v466_v47 }
 0x138   : > { %478 = vst [vmem:[%s178_s4] sm:$0xff] %v476_v49  ;;  %v477_v51 = vmax.f32 %v475_v50, 0.0 }
 0x13a   : > { %479 = vst [vmem:[%s178_s4 + $0x8] sm:$0xff] %v477_v51 }
 0x13b   : > { %778 = shalt.err (!%p775_p7)
}
 0x13c   : > { %s779_s20 = scalar_lea.hbm %s987_s9, 256  ;;  %s783_s26 = scalar_lea.hbm %s1033_s3, 512 }
 0x13d   : > { %p780_p8 = scmp.ne.s32.totalorder %s987_s9, %s779_s20  ;;  %p784_p1 = scmp.lt.u32.totalorder %s987_s9, %s1033_s3 }
 0x13e   : > { %p785_p0 = scmp.lt.u32.totalorder %s783_s26, %s779_s20  ;;  %p787_p6 = scmp.lt.u32.totalorder %s779_s20, %s987_s9 }
 0x13f   : > { %p781_p11 = pnand %p780_p8, %p1044_p9 }
 0x140   : > { %p786_p5 = por %p785_p0, %p784_p1 }
 0x141   : > { %p782_p13 = pneg %p781_p11 }
 0x142   : > { %p788_p10 = por %p787_p6, %p786_p5 }
 0x144   : > { %p789_p12 = pnand %p788_p10, %p782_p13 }
 0x146   : > { %792 = shalt.err (!%p789_p12)
}
 0x147   : > { %s839_s29 = smov 128   ;;  %s840_s30 = smov 8  }
 0x148   : > { %668 = dma.vmem_to_hbm [thread:$0]  (%p1044_p9), %s982_s5, 256, %s987_s9, %s989_s10, %s839_s29, %s839_s29, %s840_s30  }
 0x149 PF: > { %p680_p2 = scmp.ge.s32.totalorder %s831_s15, 2  ;;  %s509_s4 = sand.u32 1, %s819_s12  }
 0x14a   : > { %p1045_p3 = scmp.ne.s32.totalorder %s1038_s23, 0  ;;  %s510_s6 = scalar_lea.sflag [#allocation4], %s509_s4 }
 0x14c   : > { %p675_p4 = pnand %p680_p2, %p1045_p3 }
 0x14e   : > { %814 = dma.done.wait (!%p675_p4), %s510_s6, 256  }
 0x14f   : > { %816 = vsyncadd (!%p675_p4), %s510_s6, 4294967040  ;;  %p14_p7 = scmp.ge.s32.totalorder %s886_s18, 4   ;;  %s1046_s12 = smov %s823_s13 }
 0x150   : > { %s1047_s13 = smov %s827_s14  ;;  %s1048_s14 = smov %s897_s21 }
 0x151   : > { %s1049_s15 = smov %s886_s18  ;;  %16 = sbr.rel (!%p14_p7) target bundleno = 4 (0x4), region = 74 }
 0x158   :  { %515 = vsyncpa [#allocation3], 1 }
 0x159   :  { %517 = vsyncpa [#allocation3 + $0x1], 1 }
 0x15a   :  { %518 = vsyncpa [#allocation4], 1 }
 0x15b   :  { %520 = vsyncpa [#allocation4 + $0x1], 1 }

</bundles_post_ra>
